<compile_context>
chip_gen: v7x
topology: tpu7x:2x2x1
jax: 0.10.0
libtpu: 0.0.40
codegen_flags: <defaults>
</compile_context>

<pallas_src>
import jax
import jax.numpy as jnp
import numpy as np
from jax import lax
from jax.experimental import pallas as pl
from jax.experimental.pallas import tpu as pltpu

EPS = 1e-4          # standard ProtoPNet log-activation epsilon
LANE = 128          # TPU lane width (spatial axis lives here)
SUBLANE = 8         # f32 sublane tile
BF16_SUBLANE = 16   # bf16 sublane pack


def _round_up(n, m):
    return ((n + m - 1) // m) * m


def _choose_tiling(hw, max_tile=2048):
    """Spatial tiling.

    Pads HW to a 128 multiple, picks the largest dividing tile <= max_tile,
    and splits the spatial axis into two independent halves whenever possible
    so both v7x TensorCores get work even at batch 1 (no effect on v5e/v6e).
    """
    hw_pad = _round_up(hw, LANE)
    thw = LANE
    t = min(max_tile, hw_pad)
    t -= t % LANE
    while t >= LANE:
        if hw_pad % t == 0:
            thw = t
            break
        t -= LANE
    n_t = hw_pad // thw
    if n_t % 2 == 0:
        n_split, n_half = 2, n_t // 2
    elif thw % 256 == 0:          # single wide tile: halve it to enable 2-way split
        thw //= 2
        n_split, n_half = 2, n_t
    else:
        n_split, n_half = 1, n_t
    return hw_pad, thw, n_split, n_half


# ---------------------------------------------------------------------------
# Fused kernel: one (batch, spatial-half, spatial-tile) grid step.
#   stage 1: backbone stub (1x1 conv + ReLU) + add-on (1x1 conv+ReLU,
#            1x1 conv+Sigmoid) as chained W @ x bf16 MXU matmuls, f32 acc,
#            features on sublanes / HW on lanes.
#   stage 2: squared-L2 distance to every prototype + log activation,
#            (P, THW) with P = 16 on sublanes.
#   stage 3: running max over spatial tiles (k_for_topk == 1), padded HW
#            tail masked out; per-half partial max emitted on the last tile.
#   (class-connection head + max-over-halves are done in the wrapper.)
# ---------------------------------------------------------------------------
def _make_kernel(thw, n_half, hw, hw_pad):
    need_mask = hw_pad != hw

    def kernel(x_ref, wbb_ref, bbb_ref, w1_ref, b1_ref, w2_ref, b2_ref,
               proto_ref, pnorm_ref, act_map_ref, pact_ref, max_scratch):
        t = pl.program_id(2)

        # ---- stage 1: features for this spatial tile ----------------------
        x = x_ref[0]                                          # (Cin_pad, THW) bf16
        h = jnp.dot(wbb_ref[...], x, preferred_element_type=jnp.float32)
        h = jnp.maximum(h + bbb_ref[...], 0.0)                # (CBB, THW)
        h = jnp.dot(w1_ref[...], h.astype(jnp.bfloat16),
                    preferred_element_type=jnp.float32)
        h = jnp.maximum(h + b1_ref[...], 0.0)                 # (CMID, THW)
        h = jnp.dot(w2_ref[...], h.astype(jnp.bfloat16),
                    preferred_element_type=jnp.float32)
        z = jax.nn.sigmoid(h + b2_ref[...])                   # (D, THW) f32

        # ---- stage 2: prototype distances (P on sublanes, HW on lanes) ----
        dots = jnp.dot(proto_ref[...], z.astype(jnp.bfloat16),
                       preferred_element_type=jnp.float32)    # (P, THW)
        znorm = jnp.sum(z * z, axis=0, keepdims=True)         # (1, THW) f32
        dist = jnp.maximum(znorm - 2.0 * dots + pnorm_ref[...], 0.0)
        act = jnp.log(dist + 1.0) - jnp.log(dist + EPS)       # (P, THW)
        act_map_ref[0] = act

        # ---- stage 3: running max over spatial tiles -----------------------
        if need_mask:
            s = pl.program_id(1)
            col = (s * n_half + t) * thw + lax.broadcasted_iota(
                jnp.int32, (1, thw), 1)
            act = jnp.where(col < hw, act, -jnp.inf)
        tile_max = jnp.max(act, axis=1, keepdims=True)        # (P, 1)

        @pl.when(t == 0)
        def _():
            max_scratch[...] = jnp.full(max_scratch.shape, -jnp.inf,
                                        max_scratch.dtype)

        max_scratch[...] = jnp.maximum(max_scratch[...], tile_max)

        @pl.when(t == pl.num_programs(2) - 1)
        def _():
            pact_ref[0, 0] = max_scratch[...]

    return kernel


# ---------------------------------------------------------------------------
# One-time parameter preparation: transpose weights to (out, in), pad only the
# input-channel axis (3 -> 16), cast matmul operands to bf16, precompute
# ||prototype||^2.  Done once, not per forward pass.
# ---------------------------------------------------------------------------
def prepare_params(params):
    c_in, c_bb = params["w_bb"].shape
    c_mid, d = params["w2"].shape
    p = params["protos"].shape[0]
    nc = params["w_cls"].shape[0]
    cin_pad = _round_up(c_in, BF16_SUBLANE)
    p_pad = _round_up(p, SUBLANE)

    protos_2d = params["protos"].reshape(p, d).astype(jnp.float32)
    protos_pad = jnp.pad(protos_2d, ((0, p_pad - p), (0, 0)))

    prepped = {
        # weights stored (out, in); kernel computes W @ x with HW on lanes
        "w_bb": jnp.pad(params["w_bb"].T,
                        ((0, 0), (0, cin_pad - c_in))).astype(jnp.bfloat16),
        "b_bb": params["b_bb"].reshape(c_bb, 1).astype(jnp.float32),
        "w1": params["w1"].T.astype(jnp.bfloat16),             # (CMID, CBB)
        "b1": params["b1"].reshape(c_mid, 1).astype(jnp.float32),
        "w2": params["w2"].T.astype(jnp.bfloat16),              # (D, CMID)
        "b2": params["b2"].reshape(d, 1).astype(jnp.float32),
        "protos": protos_pad.astype(jnp.bfloat16),              # (Pp, D)
        "pnorm": jnp.sum(protos_pad * protos_pad, axis=1, keepdims=True),
        "w_cls": params["w_cls"].astype(jnp.float32),           # (NC, P) wrapper-side
    }
    dims = dict(c_in=c_in, d=d, p=p, nc=nc, cin_pad=cin_pad, p_pad=p_pad)
    return prepped, dims


def protopnet_forward(x_nchw, pp, dims):
    """Forward pass. x_nchw: (B, C_in, H, W) float32. pp: prepared params."""
    B, c_in, H, W = x_nchw.shape
    HW = H * W
    cin_pad, p_pad, p_real = dims["cin_pad"], dims["p_pad"], dims["p"]

    hw_pad, thw, n_split, n_half = _choose_tiling(HW)

    # NCHW -> (B, Cin_pad, HW_pad) bf16: channels already precede spatial, so
    # this is reshape + zero-pad + cast only (no host-side transpose).
    x = x_nchw.reshape(B, c_in, HW)
    x = jnp.pad(x, ((0, 0), (0, cin_pad - c_in),
                    (0, hw_pad - HW))).astype(jnp.bfloat16)

    def _full(arr):
        nd = arr.ndim
        return pl.BlockSpec(arr.shape, lambda *_: (0,) * nd)

    kernel = _make_kernel(thw, n_half, HW, hw_pad)

    grid_spec = pltpu.PrefetchScalarGridSpec(
        num_scalar_prefetch=0,
        grid=(B, n_split, n_half),
        in_specs=[
            pl.BlockSpec((1, cin_pad, thw),
                         lambda b, s, t: (b, 0, s * n_half + t)),
            _full(pp["w_bb"]), _full(pp["b_bb"]),
            _full(pp["w1"]), _full(pp["b1"]),
            _full(pp["w2"]), _full(pp["b2"]),
            _full(pp["protos"]), _full(pp["pnorm"]),
        ],
        out_specs=[
            pl.BlockSpec((1, p_pad, thw),
                         lambda b, s, t: (b, 0, s * n_half + t)),   # act map
            pl.BlockSpec((1, 1, p_pad, 1),
                         lambda b, s, t: (b, s, 0, 0)),             # partial max
        ],
        scratch_shapes=[pltpu.VMEM((p_pad, 1), jnp.float32)],
    )

    act_map, pact = pl.pallas_call(
        kernel,
        out_shape=(
            jax.ShapeDtypeStruct((B, p_pad, hw_pad), jnp.float32),
            jax.ShapeDtypeStruct((B, n_split, p_pad, 1), jnp.float32),
        ),
        grid_spec=grid_spec,
        compiler_params=pltpu.CompilerParams(
            dimension_semantics=("parallel", "parallel", "arbitrary")),
    )(x, pp["w_bb"], pp["b_bb"], pp["w1"], pp["b1"], pp["w2"], pp["b2"],
      pp["protos"], pp["pnorm"])

    # Final max over spatial halves + class-connection head: (B,16)x(16,NC) is
    # far below MXU granularity, so it stays in XLA.
    proto_act = jnp.max(pact[:, :, :p_real, 0], axis=1)          # (B, P)
    logits = proto_act @ pp["w_cls"].T                           # (B, NC)
    # (B, P_pad, HW_pad) -> (B, P, H, W); bilinear upsample to input resolution
    # omitted (see TODO at top)
    upsampled_activation = act_map[:, :p_real, :HW].reshape(B, p_real, H, W)

    return {
        "logits": logits,
        "prototype_activations": proto_act,
        "upsampled_activation": upsampled_activation,
    }


# ---------------------------------------------------------------------------
# Pure-JAX reference (unpadded), mirroring the kernel's bf16-MXU /
# f32-accumulate arithmetic for a tight numerical check.
# ---------------------------------------------------------------------------
def reference_forward(x_nchw, params):
    B, c_in, H, W = x_nchw.shape
    HW = H * W
    d = params["w2"].shape[1]
    p = params["protos"].shape[0]
    bf, f32 = jnp.bfloat16, jnp.float32

    xf = jnp.transpose(x_nchw, (0, 2, 3, 1)).reshape(B * HW, c_in)
    h = jnp.dot(xf.astype(bf), params["w_bb"].astype(bf),
                preferred_element_type=f32) + params["b_bb"]
    h = jnp.maximum(h, 0.0)
    h = jnp.dot(h.astype(bf), params["w1"].astype(bf),
                preferred_element_type=f32) + params["b1"]
    h = jnp.maximum(h, 0.0)
    h = jnp.dot(h.astype(bf), params["w2"].astype(bf),
                preferred_element_type=f32) + params["b2"]
    z = jax.nn.sigmoid(h).reshape(B, HW, d)

    protos = params["protos"].reshape(p, d)
    dots = jnp.einsum("bnd,pd->bnp", z.astype(bf), protos.astype(bf),
                      preferred_element_type=f32)
    dist = (jnp.sum(z * z, -1, keepdims=True) - 2.0 * dots
            + jnp.sum(protos * protos, -1))
    dist = jnp.maximum(dist, 0.0)
    act = jnp.log(dist + 1.0) - jnp.log(dist + EPS)              # (B, HW, P)
    proto_act = jnp.max(act, axis=1)                             # (B, P)
    logits = proto_act @ params["w_cls"].T                       # (B, NC)
    act_map = jnp.transpose(act, (0, 2, 1)).reshape(B, p, H, W)
    return logits, proto_act, act_map


def make_params(key, c_in=3, c_bb=64, c_mid=64, d=32, num_protos=16,
                num_classes=4):
    ks = jax.random.split(key, 6)
    scale = 0.1
    params = {
        "w_bb": scale * jax.random.normal(ks[0], (c_in, c_bb), jnp.float32),
        "b_bb": jnp.zeros((1, c_bb), jnp.float32),
        "w1": scale * jax.random.normal(ks[1], (c_bb, c_mid), jnp.float32),
        "b1": jnp.zeros((1, c_mid), jnp.float32),
        "w2": scale * jax.random.normal(ks[2], (c_mid, d), jnp.float32),
        "b2": jnp.zeros((1, d), jnp.float32),
        # prototype_tensors: (num_prototypes, latent_channels, 1, 1)
        "protos": jax.random.uniform(ks[3], (num_protos, d, 1, 1),
                                     jnp.float32),
    }
    # class_connection_layer init: +1 for own class, -0.5 otherwise
    protos_per_class = num_protos // num_classes
    class_identity = jnp.zeros((num_protos, num_classes), jnp.float32)
    class_identity = class_identity.at[
        jnp.arange(num_protos), jnp.arange(num_protos) // protos_per_class
    ].set(1.0)
    params["w_cls"] = (class_identity.T * 1.5 - 0.5)  # (num_classes, P)
    return params


if __name__ == "__main__":
    key = jax.random.PRNGKey(0)
    k_x, k_p = jax.random.split(key)

    B, C_in, H, W = 2, 3, 16, 16
    x = jax.random.normal(k_x, (B, C_in, H, W), jnp.float32)
    params = make_params(k_p, c_in=C_in)

    prepped, dims = prepare_params(params)     # one-time transpose / pad / cast
    fwd = jax.jit(lambda xx, pp: protopnet_forward(xx, pp, dims))

    out = fwd(x, prepped)
    jax.block_until_ready(out)

    ref_logits, ref_proto_act, ref_act_map = reference_forward(x, params)
    np.testing.assert_allclose(np.asarray(out["prototype_activations"]),
                               np.asarray(ref_proto_act),
                               rtol=2e-3, atol=2e-3)
    np.testing.assert_allclose(np.asarray(out["logits"]),
                               np.asarray(ref_logits),
                               rtol=2e-3, atol=2e-3)
    np.testing.assert_allclose(np.asarray(out["upsampled_activation"]),
                               np.asarray(ref_act_map),
                               rtol=2e-3, atol=2e-3)
    assert out["upsampled_activation"].shape == (B, params["protos"].shape[0],
                                                 H, W)
    print("KERNEL_OK")
</pallas_src>

<mosaic_0001>
module attributes {stable_mosaic.version = 11 : i64} {
  func.func @kernel(%arg0: i32, %arg1: i32, %arg2: i32, %arg3: memref<1x16x128xbf16, #tpu.memory_space<vmem>>, %arg4: memref<64x16xbf16, #tpu.memory_space<vmem>>, %arg5: memref<64x1xf32, #tpu.memory_space<vmem>>, %arg6: memref<64x64xbf16, #tpu.memory_space<vmem>>, %arg7: memref<64x1xf32, #tpu.memory_space<vmem>>, %arg8: memref<32x64xbf16, #tpu.memory_space<vmem>>, %arg9: memref<32x1xf32, #tpu.memory_space<vmem>>, %arg10: memref<16x32xbf16, #tpu.memory_space<vmem>>, %arg11: memref<16x1xf32, #tpu.memory_space<vmem>>, %arg12: memref<1x16x128xf32, #tpu.memory_space<vmem>>, %arg13: memref<1x1x16x1xf32, #tpu.memory_space<vmem>>, %arg14: memref<16x1xf32, #tpu.memory_space<vmem>>) attributes {dimension_semantics = [#tpu.dimension_semantics<parallel>, #tpu.dimension_semantics<parallel>, #tpu.dimension_semantics<arbitrary>], iteration_bounds = array<i64: 2, 2, 1>, scalar_prefetch = 0 : i64, scratch_operands = 1 : i64, tpu.core_type = #tpu.core_type<tc>, window_params = [{transform_indices = @transform_0, window_bounds = array<i64: 1, 16, 128>}, {pipeline_mode = #tpu.pipeline_mode<synchronous>, transform_indices = @transform_1, window_bounds = array<i64: 64, 16>}, {pipeline_mode = #tpu.pipeline_mode<synchronous>, transform_indices = @transform_2, window_bounds = array<i64: 64, 1>}, {pipeline_mode = #tpu.pipeline_mode<synchronous>, transform_indices = @transform_3, window_bounds = array<i64: 64, 64>}, {pipeline_mode = #tpu.pipeline_mode<synchronous>, transform_indices = @transform_4, window_bounds = array<i64: 64, 1>}, {pipeline_mode = #tpu.pipeline_mode<synchronous>, transform_indices = @transform_5, window_bounds = array<i64: 32, 64>}, {pipeline_mode = #tpu.pipeline_mode<synchronous>, transform_indices = @transform_6, window_bounds = array<i64: 32, 1>}, {pipeline_mode = #tpu.pipeline_mode<synchronous>, transform_indices = @transform_7, window_bounds = array<i64: 16, 32>}, {pipeline_mode = #tpu.pipeline_mode<synchronous>, transform_indices = @transform_8, window_bounds = array<i64: 16, 1>}, {transform_indices = @transform_9, window_bounds = array<i64: 1, 16, 128>}, {transform_indices = @transform_10, window_bounds = array<i64: 1, 1, 16, 1>}]} {
    %c0 = arith.constant 0 : index
    %c0_0 = arith.constant 0 : index
    %c0_1 = arith.constant 0 : index
    %0 = vector.load %arg3[%c0, %c0_0, %c0_1] : memref<1x16x128xbf16, #tpu.memory_space<vmem>>, vector<1x16x128xbf16>
    %1 = vector.shape_cast %0 : vector<1x16x128xbf16> to vector<16x128xbf16>
    %c0_2 = arith.constant 0 : index
    %c0_3 = arith.constant 0 : index
    %2 = vector.load %arg4[%c0_2, %c0_3] : memref<64x16xbf16, #tpu.memory_space<vmem>>, vector<64x16xbf16>
    %cst = arith.constant dense<0.000000e+00> : vector<64x128xf32>
    %3 = tpu.matmul %2, %1, %cst {dimension_numbers = #tpu.dot_dimension_numbers<[1], [0], [0], [1], [0, 0, 1, 1], [], []>} : vector<64x16xbf16>, vector<16x128xbf16>, vector<64x128xf32> -> vector<64x128xf32>
    %c0_4 = arith.constant 0 : index
    %c0_5 = arith.constant 0 : index
    %4 = vector.load %arg5[%c0_4, %c0_5] : memref<64x1xf32, #tpu.memory_space<vmem>>, vector<64x1xf32>
    %5 = vector.broadcast %4 : vector<64x1xf32> to vector<64x128xf32>
    %6 = arith.addf %3, %5 : vector<64x128xf32>
    %cst_6 = arith.constant 0.000000e+00 : f32
    %7 = vector.broadcast %cst_6 : f32 to vector<64x128xf32>
    %8 = arith.maximumf %6, %7 : vector<64x128xf32>
    %c0_7 = arith.constant 0 : index
    %c0_8 = arith.constant 0 : index
    %9 = vector.load %arg6[%c0_7, %c0_8] : memref<64x64xbf16, #tpu.memory_space<vmem>>, vector<64x64xbf16>
    %10 = arith.truncf %8 : vector<64x128xf32> to vector<64x128xbf16>
    %cst_9 = arith.constant dense<0.000000e+00> : vector<64x128xf32>
    %11 = tpu.matmul %9, %10, %cst_9 {dimension_numbers = #tpu.dot_dimension_numbers<[1], [0], [0], [1], [0, 0, 1, 1], [], []>} : vector<64x64xbf16>, vector<64x128xbf16>, vector<64x128xf32> -> vector<64x128xf32>
    %c0_10 = arith.constant 0 : index
    %c0_11 = arith.constant 0 : index
    %12 = vector.load %arg7[%c0_10, %c0_11] : memref<64x1xf32, #tpu.memory_space<vmem>>, vector<64x1xf32>
    %13 = vector.broadcast %12 : vector<64x1xf32> to vector<64x128xf32>
    %14 = arith.addf %11, %13 : vector<64x128xf32>
    %cst_12 = arith.constant 0.000000e+00 : f32
    %15 = vector.broadcast %cst_12 : f32 to vector<64x128xf32>
    %16 = arith.maximumf %14, %15 : vector<64x128xf32>
    %c0_13 = arith.constant 0 : index
    %c0_14 = arith.constant 0 : index
    %17 = vector.load %arg8[%c0_13, %c0_14] : memref<32x64xbf16, #tpu.memory_space<vmem>>, vector<32x64xbf16>
    %18 = arith.truncf %16 : vector<64x128xf32> to vector<64x128xbf16>
    %cst_15 = arith.constant dense<0.000000e+00> : vector<32x128xf32>
    %19 = tpu.matmul %17, %18, %cst_15 {dimension_numbers = #tpu.dot_dimension_numbers<[1], [0], [0], [1], [0, 0, 1, 1], [], []>} : vector<32x64xbf16>, vector<64x128xbf16>, vector<32x128xf32> -> vector<32x128xf32>
    %c0_16 = arith.constant 0 : index
    %c0_17 = arith.constant 0 : index
    %20 = vector.load %arg9[%c0_16, %c0_17] : memref<32x1xf32, #tpu.memory_space<vmem>>, vector<32x1xf32>
    %21 = vector.broadcast %20 : vector<32x1xf32> to vector<32x128xf32>
    %22 = arith.addf %19, %21 : vector<32x128xf32>
    %23 = arith.negf %22 : vector<32x128xf32>
    %24 = math.exp %23 : vector<32x128xf32>
    %cst_18 = arith.constant 1.000000e+00 : f32
    %25 = vector.broadcast %cst_18 : f32 to vector<32x128xf32>
    %26 = arith.addf %25, %24 : vector<32x128xf32>
    %27 = arith.divf %25, %26 : vector<32x128xf32>
    %c0_19 = arith.constant 0 : index
    %c0_20 = arith.constant 0 : index
    %28 = vector.load %arg10[%c0_19, %c0_20] : memref<16x32xbf16, #tpu.memory_space<vmem>>, vector<16x32xbf16>
    %29 = arith.truncf %27 : vector<32x128xf32> to vector<32x128xbf16>
    %cst_21 = arith.constant dense<0.000000e+00> : vector<16x128xf32>
    %30 = tpu.matmul %28, %29, %cst_21 {dimension_numbers = #tpu.dot_dimension_numbers<[1], [0], [0], [1], [0, 0, 1, 1], [], []>} : vector<16x32xbf16>, vector<32x128xbf16>, vector<16x128xf32> -> vector<16x128xf32>
    %31 = arith.mulf %27, %27 : vector<32x128xf32>
    %cst_22 = arith.constant dense<0.000000e+00> : vector<128xf32>
    %32 = vector.multi_reduction <add>, %31, %cst_22 [0] : vector<32x128xf32> to vector<128xf32>
    %33 = vector.shape_cast %32 : vector<128xf32> to vector<1x128xf32>
    %cst_23 = arith.constant 2.000000e+00 : f32
    %34 = vector.broadcast %cst_23 : f32 to vector<16x128xf32>
    %35 = arith.mulf %34, %30 : vector<16x128xf32>
    %36 = vector.broadcast %33 : vector<1x128xf32> to vector<16x128xf32>
    %37 = arith.subf %36, %35 : vector<16x128xf32>
    %c0_24 = arith.constant 0 : index
    %c0_25 = arith.constant 0 : index
    %38 = vector.load %arg11[%c0_24, %c0_25] : memref<16x1xf32, #tpu.memory_space<vmem>>, vector<16x1xf32>
    %39 = vector.broadcast %38 : vector<16x1xf32> to vector<16x128xf32>
    %40 = arith.addf %37, %39 : vector<16x128xf32>
    %cst_26 = arith.constant 0.000000e+00 : f32
    %41 = vector.broadcast %cst_26 : f32 to vector<16x128xf32>
    %42 = arith.maximumf %40, %41 : vector<16x128xf32>
    %cst_27 = arith.constant 1.000000e+00 : f32
    %43 = vector.broadcast %cst_27 : f32 to vector<16x128xf32>
    %44 = arith.addf %42, %43 : vector<16x128xf32>
    %45 = math.log %44 : vector<16x128xf32>
    %cst_28 = arith.constant 9.99999974E-5 : f32
    %46 = vector.broadcast %cst_28 : f32 to vector<16x128xf32>
    %47 = arith.addf %42, %46 : vector<16x128xf32>
    %48 = math.log %47 : vector<16x128xf32>
    %49 = arith.subf %45, %48 : vector<16x128xf32>
    %c0_29 = arith.constant 0 : index
    %c0_30 = arith.constant 0 : index
    %c0_31 = arith.constant 0 : index
    %50 = vector.load %arg12[%c0_29, %c0_30, %c0_31] : memref<1x16x128xf32, #tpu.memory_space<vmem>>, vector<1x16x128xf32>
    %51 = vector.shape_cast %50 : vector<1x16x128xf32> to vector<16x128xf32>
    %52 = vector.shape_cast %49 : vector<16x128xf32> to vector<1x16x128xf32>
    tpu.vector_store %arg12[%c0_29, %c0_30, %c0_31], %52 {strides = array<i32>} : memref<1x16x128xf32, #tpu.memory_space<vmem>>, vector<1x16x128xf32>,
    %cst_32 = arith.constant dense<0xFF800000> : vector<16xf32>
    %53 = vector.multi_reduction <maximumf>, %49, %cst_32 [1] : vector<16x128xf32> to vector<16xf32>
    %54 = vector.shape_cast %53 : vector<16xf32> to vector<16x1xf32>
    %c0_i32 = arith.constant 0 : i32
    %55 = arith.cmpi eq, %arg2, %c0_i32 : i32
    %56 = arith.extui %55 : i1 to i32
    %c0_i32_33 = arith.constant 0 : i32
    %57 = arith.cmpi ne, %56, %c0_i32_33 : i32
    scf.if %57 {
      %cst_40 = arith.constant 0xFF800000 : f32
      %64 = vector.broadcast %cst_40 : f32 to vector<16x1xf32>
      %c0_41 = arith.constant 0 : index
      %c0_42 = arith.constant 0 : index
      %65 = vector.load %arg14[%c0_41, %c0_42] : memref<16x1xf32, #tpu.memory_space<vmem>>, vector<16x1xf32>
      tpu.vector_store %arg14[%c0_41, %c0_42], %64 {strides = array<i32>} : memref<16x1xf32, #tpu.memory_space<vmem>>, vector<16x1xf32>,
    } else {
    }
    %c0_34 = arith.constant 0 : index
    %c0_35 = arith.constant 0 : index
    %58 = vector.load %arg14[%c0_34, %c0_35] : memref<16x1xf32, #tpu.memory_space<vmem>>, vector<16x1xf32>
    %59 = arith.maximumf %58, %54 : vector<16x1xf32>
    %c0_36 = arith.constant 0 : index
    %c0_37 = arith.constant 0 : index
    %60 = vector.load %arg14[%c0_36, %c0_37] : memref<16x1xf32, #tpu.memory_space<vmem>>, vector<16x1xf32>
    tpu.vector_store %arg14[%c0_36, %c0_37], %59 {strides = array<i32>} : memref<16x1xf32, #tpu.memory_space<vmem>>, vector<16x1xf32>,
    %c0_i32_38 = arith.constant 0 : i32
    %61 = arith.cmpi eq, %arg2, %c0_i32_38 : i32
    %62 = arith.extui %61 : i1 to i32
    %c0_i32_39 = arith.constant 0 : i32
    %63 = arith.cmpi ne, %62, %c0_i32_39 : i32
    scf.if %63 {
      %c0_40 = arith.constant 0 : index
      %c0_41 = arith.constant 0 : index
      %64 = vector.load %arg14[%c0_40, %c0_41] : memref<16x1xf32, #tpu.memory_space<vmem>>, vector<16x1xf32>
      %c0_42 = arith.constant 0 : index
      %c0_43 = arith.constant 0 : index
      %c0_44 = arith.constant 0 : index
      %c0_45 = arith.constant 0 : index
      %65 = vector.load %arg13[%c0_42, %c0_43, %c0_44, %c0_45] : memref<1x1x16x1xf32, #tpu.memory_space<vmem>>, vector<1x1x16x1xf32>
      %66 = vector.shape_cast %65 : vector<1x1x16x1xf32> to vector<16x1xf32>
      %67 = vector.shape_cast %64 : vector<16x1xf32> to vector<1x1x16x1xf32>
      tpu.vector_store %arg13[%c0_42, %c0_43, %c0_44, %c0_45], %67 {strides = array<i32>} : memref<1x1x16x1xf32, #tpu.memory_space<vmem>>, vector<1x1x16x1xf32>,
    } else {
    }
    return
  }
  func.func @transform_0(%arg0: i32, %arg1: i32, %arg2: i32) -> (i32, i32, i32) {
    %c1_i32 = arith.constant 1 : i32
    %0 = arith.muli %arg1, %c1_i32 : i32
    %1 = arith.addi %0, %arg2 : i32
    %c0_i32 = arith.constant 0 : i32
    %c0_i32_0 = arith.constant 0 : i32
    return %arg0, %c0_i32, %1 : i32, i32, i32
  }
  func.func @transform_1(%arg0: i32, %arg1: i32, %arg2: i32) -> (i32, i32) {
    %c0_i32 = arith.constant 0 : i32
    %c0_i32_0 = arith.constant 0 : i32
    %c0_i32_1 = arith.constant 0 : i32
    return %c0_i32, %c0_i32_0 : i32, i32
  }
  func.func @transform_2(%arg0: i32, %arg1: i32, %arg2: i32) -> (i32, i32) {
    %c0_i32 = arith.constant 0 : i32
    %c0_i32_0 = arith.constant 0 : i32
    %c0_i32_1 = arith.constant 0 : i32
    return %c0_i32, %c0_i32_0 : i32, i32
  }
  func.func @transform_3(%arg0: i32, %arg1: i32, %arg2: i32) -> (i32, i32) {
    %c0_i32 = arith.constant 0 : i32
    %c0_i32_0 = arith.constant 0 : i32
    %c0_i32_1 = arith.constant 0 : i32
    return %c0_i32, %c0_i32_0 : i32, i32
  }
  func.func @transform_4(%arg0: i32, %arg1: i32, %arg2: i32) -> (i32, i32) {
    %c0_i32 = arith.constant 0 : i32
    %c0_i32_0 = arith.constant 0 : i32
    %c0_i32_1 = arith.constant 0 : i32
    return %c0_i32, %c0_i32_0 : i32, i32
  }
  func.func @transform_5(%arg0: i32, %arg1: i32, %arg2: i32) -> (i32, i32) {
    %c0_i32 = arith.constant 0 : i32
    %c0_i32_0 = arith.constant 0 : i32
    %c0_i32_1 = arith.constant 0 : i32
    return %c0_i32, %c0_i32_0 : i32, i32
  }
  func.func @transform_6(%arg0: i32, %arg1: i32, %arg2: i32) -> (i32, i32) {
    %c0_i32 = arith.constant 0 : i32
    %c0_i32_0 = arith.constant 0 : i32
    %c0_i32_1 = arith.constant 0 : i32
    return %c0_i32, %c0_i32_0 : i32, i32
  }
  func.func @transform_7(%arg0: i32, %arg1: i32, %arg2: i32) -> (i32, i32) {
    %c0_i32 = arith.constant 0 : i32
    %c0_i32_0 = arith.constant 0 : i32
    %c0_i32_1 = arith.constant 0 : i32
    return %c0_i32, %c0_i32_0 : i32, i32
  }
  func.func @transform_8(%arg0: i32, %arg1: i32, %arg2: i32) -> (i32, i32) {
    %c0_i32 = arith.constant 0 : i32
    %c0_i32_0 = arith.constant 0 : i32
    %c0_i32_1 = arith.constant 0 : i32
    return %c0_i32, %c0_i32_0 : i32, i32
  }
  func.func @transform_9(%arg0: i32, %arg1: i32, %arg2: i32) -> (i32, i32, i32) {
    %c1_i32 = arith.constant 1 : i32
    %0 = arith.muli %arg1, %c1_i32 : i32
    %1 = arith.addi %0, %arg2 : i32
    %c0_i32 = arith.constant 0 : i32
    %c0_i32_0 = arith.constant 0 : i32
    return %arg0, %c0_i32, %1 : i32, i32, i32
  }
  func.func @transform_10(%arg0: i32, %arg1: i32, %arg2: i32) -> (i32, i32, i32, i32) {
    %c0_i32 = arith.constant 0 : i32
    %c0_i32_0 = arith.constant 0 : i32
    %c0_i32_1 = arith.constant 0 : i32
    return %arg0, %arg1, %c0_i32, %c0_i32_0 : i32, i32, i32, i32
  }
}

</mosaic_0001>

<bundles_post_ra>
// kernel: _lambda_.1
= control target key start
LH: loop header
LB: loop body
LE: loop exit
PB: predicated region body
PF: predicated region fallthrough
CT: control target
= control target key end

     0   :  { %s1772_s0 = inlined_call_operand.vmem [shape: bf16[2,16,256], index: 0, kind: input, shape index: {}]   ;;  %s1773_s1 = inlined_call_operand.vmem [shape: bf16[64,16], index: 1, kind: input, shape index: {}]   ;;  %s1774_s2 = inlined_call_operand.vmem [shape: f32[64,1], index: 2, kind: input, shape index: {}]   ;;  %s1775_s3 = inlined_call_operand.vmem [shape: bf16[64,64], index: 3, kind: input, shape index: {}]   ;;  %s1776_s4 = inlined_call_operand.vmem [shape: f32[64,1], index: 4, kind: input, shape index: {}]   ;;  %s1777_s5 = inlined_call_operand.vmem [shape: bf16[32,64], index: 5, kind: input, shape index: {}]   ;;  %s1778_s6 = inlined_call_operand.vmem [shape: f32[32,1], index: 6, kind: input, shape index: {}]   ;;  %s1779_s7 = inlined_call_operand.vmem [shape: bf16[16,32], index: 7, kind: input, shape index: {}]   ;;  %s1780_s8 = inlined_call_operand.vmem [shape: f32[16,1], index: 8, kind: input, shape index: {}]   ;;  %s1781_s9 = inlined_call_operand.vmem [shape: f32[2,16,256], index: 9, kind: output, shape index: {0}]   ;;  %s1782_s10 = inlined_call_operand.vmem [shape: f32[2,2,16,1], index: 10, kind: output, shape index: {1}]  }
   0x1   :  { %1784 = sst [smem:[#allocation6_spill]] %s1781_s9 }
   0x2   :  { %s1544_s13 = smov 0   ;;  %s1546_s14 = smov 0  }
   0x3   :  { %s1548_s15 = smov 0   ;;  %s1550_s16 = smov 0  }
   0x4   :  { %s1552_s17 = smov 0   ;;  %s1554_s18 = smov 0  }
   0x5   :  { %s1556_s19 = smov 0  }
   0x6 LB: > { %s36_s20 = sadd.s32 1, %s1475_s17  ;;  %s40_s21 = sadd.s32 1, %s1479_s18  ;;  %s1483_s19 = sphi %s1556_s19, %s21_s19   ;;  %s1479_s18 = sphi %s1554_s18, %s1794_s18   ;;  %s1475_s17 = sphi %s1552_s17, %s1793_s17   ;;  %s1471_s16 = sphi %s1550_s16, %s1792_s16   ;;  %s1467_s15 = sphi %s1548_s15, %s1791_s15   ;;  %s1463_s14 = sphi %s1546_s14, %s1790_s14   ;;  %s1459_s13 = sphi %s1544_s13, %s1789_s13  }
   0x7   : > { %p38_p0 = scmp.ge.s32.totalorder %s36_s20, 2  ;;  %s1218_s22 = sadd.s32 4294967295, %s1483_s19  }
   0x8   : > { %p58_p1 = scmp.ne.s32.totalorder %s1463_s14, %s1459_s13  ;;  %p59_p2 = scmp.eq.s32.totalorder %s1483_s19, 0 }
   0x9   : > { %s1796_s20 = smov (%p38_p0, %s36_s20), 0  ;;  %s1798_s21 = smov (!%p38_p0, %s40_s21), %s1479_s18 }
   0xa   : > { %1785 = sst [smem:[#allocation5_spill]] %s1796_s20  ;;  %p42_p3 = scmp.ge.s32.totalorder %s1798_s21, 2 }
   0xb   : > { %p260_p4 = scmp.eq.s32.totalorder %s1218_s22, 3  ;;  %s47_s23 = ssub.s32 %s1475_s17, %s1796_s20 }
   0xc   : > { %p60_p5 = por %p59_p2, %p58_p1  ;;  %s1800_s21 = smov (%p42_p3, %s1798_s21), 0 }
   0xd   : > { %p1592_p6 = por %p260_p4, %p58_p1  ;;  %s46_s25 = ssub.s32 %s1479_s18, %s1800_s21 }
   0xe   : > { %s48_s26 = sor.u32 %s47_s23, %s46_s25  ;;  %s51_s27 = sadd.s32 1, %s1463_s14 }
   0xf   : > { %p49_p7 = scmp.eq.s32.totalorder %s48_s26, 0  ;;  %p1221_p8 = scmp.ge.s32.totalorder %s1483_s19, 4 }
  0x11   : > { %s1600_s28 = scalar_select %p49_p7, %s1463_s14, %s51_s27  }
  0x12   : > { %334 = sbr.rel (%p1221_p8) target bundleno = 32 (0x20), region = 48 }
  0x19   : > { %337 = sbr.rel (!%p60_p5) target bundleno = 32 (0x20), region = 52  ;;  %s339_s29 = sand.u32 (%p60_p5), 1, %s1463_s14  }
  0x1a   : > { %s1223_s30 = sshll.u32 (%p60_p5), %s1479_s18, 2  ;;  %s1222_s11 = sshll.u32 (%p60_p5), %s339_s29, 3 }
  0x1b   : > { %s344_s12 = sadd.s32 (%p60_p5), %s1475_s17, %s1223_s30  ;;  %s341_s25 = scalar_lea.vmem (%p60_p5), [#allocation3], %s1222_s11 }
  0x1c   : > { %s1224_s22 = sshll.u32 (%p60_p5), %s344_s12, 2 }
  0x1d   : > { %s346_s23 = scalar_lea.vmem (%p60_p5), %s1772_s0, %s1224_s22 }
  0x1e   : > { %v362_v0 = vld [vmem:[%s346_s23] sm:$0xf] (%p60_p5)  ;;  %v364_v1 = vld [vmem:[%s346_s23 + $0x8] sm:$0xf] (%p60_p5) }
  0x1f   : > { %363 = vst [vmem:[%s341_s25] sm:$0xf] (%p60_p5), %v362_v0  ;;  %365 = vst [vmem:[%s341_s25 + $0x4] sm:$0xf] (%p60_p5), %v364_v1 }
  0x20 PF: > { %p1225_p9 = scmp.ge.s32.totalorder %s1483_s19, 1  ;;  %p391_p10 = scmp.lt.s32.totalorder %s1483_s19, 5 }
  0x22   : > { %p392_p11 = pnand %p1225_p9, %p391_p10 }
  0x23   : > { %s398_s26 = sand.u32 (!%p392_p11), 1, %s1459_s13   ;;  %v1394_v2 = vld [vmem:[%s1773_s1] sm:$0xff] (!%p392_p11)   ;;  %vm539_vm0 = vcmask (!%p392_p11), 130048   ;;  %v1485_v4 = vmov (!%p392_p11), 0   ;;  %v1395_v5 = vld [vmem:[%s1773_s1 + $0x8] sm:$0xff] (!%p392_p11)   ;;  %v467_v7 = vld [vmem:[%s1774_s2 + $0x10] sm:$0xff] (!%p392_p11) }
  0x24   : > { %395 = sbr.rel (%p392_p11) target bundleno = 1162 (0x48a), region = 93  ;;  %s1226_s9 = sshll.u32 (!%p392_p11), %s398_s26, 3  ;;  %1287 = vmatprep.mubr.msk.bf16.mxu0 (!%p392_p11), %vm539_vm0, %v1394_v2  ;;  %1391 = vset.pattern.permute.xlu0 (!%p392_p11), %v1485_v4  ;;  %v465_v6 = vld [vmem:[%s1774_s2] sm:$0xff] (!%p392_p11)  ;;  %v1396_v8 = vld [vmem:[%s1773_s1 + $0x10] sm:$0xff] (!%p392_p11)   ;;  %v466_v9 = vld [vmem:[%s1774_s2 + $0x8] sm:$0xff] (!%p392_p11)  ;;  %vm705_vm1 = vcmask (!%p392_p11), 523264  }
  0x25   : > { %s400_s20 = scalar_lea.vmem (!%p392_p11), [#allocation3], %s1226_s9  ;;  %1392 = vset.pattern.permute.xlu1 (!%p392_p11), %v1485_v4  ;;  %475 = vperm.xlu0 (!%p392_p11), %1391, %v465_v6   ;;  %v468_v10 = vld [vmem:[%s1774_s2 + $0x18] sm:$0xff] (!%p392_p11)  ;;  %v469_v11 = vld [vmem:[%s1774_s2 + $0x20] sm:$0xff] (!%p392_p11)  ;;  %v470_v13 = vld [vmem:[%s1774_s2 + $0x28] sm:$0xff] (!%p392_p11)  ;;  %vm1487_vm2 = vmmov (!%p392_p11), 0   ;;  %vm921_vm3 = vcmask (!%p392_p11), 261120  }
  0x26   : > { %v1393_v3 = vld [vmem:[%s400_s20] sm:$0xff] (!%p392_p11)   ;;  %485 = vperm.xlu1 (!%p392_p11), %1392, %v467_v7   ;;  %v637_v16 = vld [vmem:[%s1776_s4] sm:$0xff] (!%p392_p11)  ;;  %v638_v17 = vld [vmem:[%s1776_s4 + $0x8] sm:$0xff] (!%p392_p11)  ;;  %vm1023_vm4 = vcmask (!%p392_p11), 7168   ;;  %s1227_s23 = sshll.u32 (!%p392_p11), %s398_s26, 4  ;;  %p445_p12 = scmp.lt.s32.totalorder (!%p392_p11), %s1471_s16, 1 }
  0x27   : > { %1285 = vmatprep.subr.bf16.mxu0 (!%p392_p11), %v1393_v3  ;;  %v1397_v12 = vld [vmem:[%s1773_s1 + $0x18] sm:$0xff] (!%p392_p11)   ;;  %v471_v14 = vld [vmem:[%s1774_s2 + $0x30] sm:$0xff] (!%p392_p11)  ;;  %v641_v20 = vld [vmem:[%s1776_s4 + $0x20] sm:$0xff] (!%p392_p11)  ;;  %s1727_s25 = scalar_lea.vmem (!%p392_p11), [#allocation4], %s1227_s23  ;;  %p447_p13 = scmp.lt.s32.totalorder (!%p392_p11), %s1467_s15, 1 }
  0x28   : > { %1286 = vmatpush3.bf16.msra.mxu0 (!%p392_p11), %v1393_v3  ;;  %v472_v15 = vld [vmem:[%s1774_s2 + $0x38] sm:$0xff] (!%p392_p11)  ;;  %v639_v18 = vld [vmem:[%s1776_s4 + $0x10] sm:$0xff] (!%p392_p11)  ;;  %v642_v21 = vld [vmem:[%s1776_s4 + $0x28] sm:$0xff] (!%p392_p11) }
  0x29   : > { %480 = vperm.xlu0 (!%p392_p11), %1391, %v466_v9   ;;  %v640_v19 = vld [vmem:[%s1776_s4 + $0x18] sm:$0xff] (!%p392_p11)  ;;  %v643_v22 = vld [vmem:[%s1776_s4 + $0x30] sm:$0xff] (!%p392_p11)  ;;  %v799_v24 = vld [vmem:[%s1778_s6] sm:$0xff] (!%p392_p11) }
  0x2a   : > { %490 = vperm.xlu1 (!%p392_p11), %1392, %v468_v10   ;;  %v644_v23 = vld [vmem:[%s1776_s4 + $0x38] sm:$0xff] (!%p392_p11)  ;;  %v800_v25 = vld [vmem:[%s1778_s6 + $0x8] sm:$0xff] (!%p392_p11)  ;;  %v801_v26 = vld [vmem:[%s1778_s6 + $0x10] sm:$0xff] (!%p392_p11) }
  0x2b   : > { %1288 = vmatmul.mubr.msk.bf16.vlgmr.msra.gmra.mrb[0].mxu0 %vm539_vm0, %v1395_v5  ;;  %v802_v27 = vld [vmem:[%s1778_s6 + $0x18] sm:$0xff]  ;;  %v983_v28 = vld [vmem:[%s1780_s8] sm:$0xff]  ;;  %v984_v29 = vld [vmem:[%s1780_s8 + $0x8] sm:$0xff]  ;;  %s446_s13 = scalar_select %p445_p12, %s1471_s16, 1 }
  0x2c   : > { %1291 = vmatprep.mubr.msk.bf16.mxu0 %vm539_vm0, %v1396_v8  ;;  %v1398_v30 = vld [vmem:[%s1775_s3] sm:$0xff]   ;;  %v1399_v3 = vld [vmem:[%s1775_s3 + $0x8] sm:$0xff]   ;;  %v1400_v4 = vld [vmem:[%s1775_s3 + $0x10] sm:$0xff]   ;;  %s448_s26 = scalar_select %p447_p13, %s1467_s15, 1 }
  0x2d   : > { %495 = vperm.xlu0 %1391, %v469_v11   ;;  %1303 = vmatprep.mubr.msk.bf16.mxu1 %vm705_vm1, %v1398_v30  ;;  %v1401_v5 = vld [vmem:[%s1775_s3 + $0x18] sm:$0xff]   ;;  %v1402_v6 = vld [vmem:[%s1777_s5] sm:$0xff]   ;;  %s1229_s29 = sshll.u32 %s446_s13, 2  ;;  %s1259_s22 = sshll.u32 (%p1592_p6), %s1471_s16, 2 }
  0x2e   : > { %500 = vperm.xlu1 %1392, %v470_v13   ;;  %s1228_s27 = sshll.u32 %s448_s26, 1  ;;  %s1058_s23 = sadd.s32 (%p1592_p6), %s1467_s15, %s1259_s22 }
  0x2f   : > { %s451_s9 = sadd.s32 %s1229_s29, %s1228_s27  ;;  %s1260_s13 = sshll.u32 (%p1592_p6), %s1058_s23, 3 }
  0x30   : > { %s1230_s20 = sshll.u32 %s451_s9, 3  ;;  %s1787_s29 = sld [smem:[#allocation6_spill]] (%p1592_p6) }
  0x31   : > { %505 = vperm.xlu0 %1391, %v471_v14   ;;  %s453_s12 = scalar_lea.vmem %s1782_s10, %s1230_s20 }
  0x32   : > { %510 = vperm.xlu1 %1392, %v472_v15  }
  0x33   : > { %1292 = vmatmul.mubr.msk.bf16.gmra.mrb[4].mxu0 %vm539_vm0, %v1397_v12 }
  0x34   : > { %1319 = vmatprep.mubr.msk.bf16.mxu0 %vm705_vm1, %v1402_v6 }
  0x35   : > { %647 = vperm.xlu0 %1391, %v637_v16  }
  0x36   : > { %652 = vperm.xlu1 %1392, %v638_v17   ;;  %s1060_s9 = scalar_lea.vmem (%p1592_p6), %s1787_s29, %s1260_s13 }
  0x39   : > { %657 = vperm.xlu0 %1391, %v639_v18  }
  0x3a   : > { %662 = vperm.xlu1 %1392, %v640_v19  }
  0x3d   : > { %667 = vperm.xlu0 %1391, %v641_v20  }
  0x3e   : > { %672 = vperm.xlu1 %1392, %v642_v21  }
  0x41   : > { %677 = vperm.xlu0 %1391, %v643_v22  }
  0x42   : > { %682 = vperm.xlu1 %1392, %v644_v23  }
  0x45   : > { %805 = vperm.xlu0 %1391, %v799_v24  }
  0x46   : > { %810 = vperm.xlu1 %1392, %v800_v25  }
  0x49   : > { %815 = vperm.xlu0 %1391, %v801_v26  }
  0x4a   : > { %820 = vperm.xlu1 %1392, %v802_v27  }
  0x4d   : > { %987 = vperm.xlu0 %1391, %v983_v28  }
  0x4e   : > { %992 = vperm.xlu1 %1392, %v984_v29  }
  0xa4   : > { %v476_v31 = vpop.permute.xlu0 %475 }
  0xa5   : > { %v486_v32 = vpop.permute.xlu1 %485 }
  0xa8   : > { %v481_v33 = vpop.permute.xlu0 %480 }
  0xa9   : > { %v491_v34 = vpop.permute.xlu1 %490 }
  0xac   : > { %v496_v38 = vpop.permute.xlu0 %495 }
  0xad   : > { %v501_v43 = vpop.permute.xlu1 %500 }
  0xb0   : > { %v506_v50 = vpop.permute.xlu0 %505 }
  0xb1   : > { %v511_v55 = vpop.permute.xlu1 %510 }
  0xb4   : > { %v648_v7 = vpop.permute.xlu0 %647 }
  0xb5   : > { %v653_v8 = vpop.permute.xlu1 %652 }
  0xb8   : > { %v658_v9 = vpop.permute.xlu0 %657 }
  0xb9   : > { %v663_v10 = vpop.permute.xlu1 %662 }
  0xbc   : > { %v668_v14 = vpop.permute.xlu0 %667 }
  0xbd   : > { %v673_v19 = vpop.permute.xlu1 %672 }
  0xc0   : > { %v678_v26 = vpop.permute.xlu0 %677 }
  0xfe   : > { %v1289_v35 = vpop.f32.mrb[0].mxu0 }
  0xff   : > { %v595_v36 = vadd.f32 %v1289_v35, %v486_v32  ;;  %v586_v37 = vpop.f32.mrb[1].mxu0 }
 0x100   : > { %v587_v39 = vadd.f32 %v586_v37, %v476_v31  ;;  %v1290_v40 = vpop.f32.mrb[2].mxu0  ;;  %v683_v31 = vpop.permute.xlu1 %682 }
 0x101   : > { %v598_v41 = vadd.f32 %v1290_v40, %v491_v34  ;;  %v589_v42 = vpop.f32.mrb[3].mxu0  ;;  %v619_v45 = vmax.f32 %v595_v36, 0.0 }
 0x102   : > { %v590_v44 = vadd.f32 %v589_v42, %v481_v33  ;;  %v617_v47 = vmax.f32 %v587_v39, 0.0 }
 0x103   : > { %v620_v46 = vmax.f32 %v598_v41, 0.0 }
 0x104   : > { %v618_v48 = vmax.f32 %v590_v44, 0.0  ;;  %v1486_v44 = vmov 0.0  }
 0x105   : > { %v634_v49 = vpack.c.bf16 %v620_v46, %v619_v45  ;;  %v806_v45 = vpop.permute.xlu0 %805  ;;  %v811_v46 = vpop.permute.xlu1 %810 }
 0x106   : > { %v1293_v51 = vpop.f32.mrb[4].mxu0  ;;  %v633_v52 = vpack.c.bf16 %v618_v48, %v617_v47 }
 0x107   : > { %v611_v53 = vadd.f32 %v1293_v51, %v506_v50  ;;  %v602_v54 = vpop.f32.mrb[5].mxu0 }
 0x108   : > { %v603_v56 = vadd.f32 %v602_v54, %v496_v38  ;;  %v1294_v57 = vpop.f32.mrb[6].mxu0  ;;  %1295 = vmatprep.subr.bf16.mxu1 %v633_v52 }
 0x109   : > { %v614_v58 = vadd.f32 %v1294_v57, %v511_v55  ;;  %v605_v59 = vpop.f32.mrb[7].mxu0  ;;  %1296 = vmatpush3.bf16.msra.mxu1 %v633_v52  ;;  %v623_v61 = vmax.f32 %v611_v53, 0.0  ;;  %v816_v47 = vpop.permute.xlu0 %815 }
 0x10a   : > { %v606_v60 = vadd.f32 %v605_v59, %v501_v43  ;;  %1297 = vmatprep.subr.bf16.mxu1 %v634_v49  ;;  %v621_v63 = vmax.f32 %v603_v56, 0.0  ;;  %v1403_v43 = vld [vmem:[%s1777_s5 + $0x8] sm:$0xff]   ;;  %v821_v51 = vpop.permute.xlu1 %820 }
 0x10b   : > { %v624_v62 = vmax.f32 %v614_v58, 0.0 }
 0x10c   : > { %v622_v0 = vmax.f32 %v606_v60, 0.0 }
 0x10d   : > { %v636_v1 = vpack.c.bf16 %v624_v62, %v623_v61  ;;  %1298 = vmatpush3.bf16.msra.mxu1 %v634_v49 }
 0x10e   : > { %v635_v2 = vpack.c.bf16 %v622_v0, %v621_v63 }
 0x110   : > { %1299 = vmatprep.subr.bf16.mxu1 %v635_v2 }
 0x111   : > { %1300 = vmatpush3.bf16.msra.mxu1 %v635_v2 }
 0x112   : > { %1301 = vmatprep.subr.bf16.mxu1 %v636_v1 }
 0x115   : > { %1302 = vmatpush3.bf16.msra.mxu1 %v636_v1 }
 0x118   : > { %1304 = vmatmul.mubr.msk.bf16.vlgmr.msra.gmra.mrb[0].mxu1 %vm705_vm1, %v1399_v3 }
 0x119   : > { %1307 = vmatprep.mubr.msk.bf16.mxu1 %vm705_vm1, %v1400_v4 }
 0x120   : > { %1308 = vmatmul.mubr.msk.bf16.gmra.mrb[4].mxu1 %vm705_vm1, %v1401_v5 }
 0x1eb   : > { %v1305_v11 = vpop.f32.mrb[0].mxu1 }
 0x1ec   : > { %v761_v12 = vadd.f32 %v1305_v11, %v658_v9  ;;  %v752_v13 = vpop.f32.mrb[1].mxu1 }
 0x1ed   : > { %v753_v15 = vadd.f32 %v752_v13, %v648_v7  ;;  %v1306_v16 = vpop.f32.mrb[2].mxu1 }
 0x1ee   : > { %v764_v17 = vadd.f32 %v1306_v16, %v663_v10  ;;  %v755_v18 = vpop.f32.mrb[3].mxu1  ;;  %v785_v21 = vmax.f32 %v761_v12, 0.0 }
 0x1ef   : > { %v756_v20 = vadd.f32 %v755_v18, %v653_v8  ;;  %v783_v23 = vmax.f32 %v753_v15, 0.0 }
 0x1f0   : > { %v786_v22 = vmax.f32 %v764_v17, 0.0  ;;  %v1404_v17 = vld [vmem:[%s1779_s7] sm:$0xff]  }
 0x1f1   : > { %v784_v24 = vmax.f32 %v756_v20, 0.0 }
 0x1f2   : > { %v796_v25 = vpack.c.bf16 %v786_v22, %v785_v21 }
 0x1f3   : > { %v795_v27 = vpack.c.bf16 %v784_v24, %v783_v23  ;;  %v1309_v28 = vpop.f32.mrb[4].mxu1 }
 0x1f4   : > { %v777_v29 = vadd.f32 %v1309_v28, %v678_v26  ;;  %v768_v30 = vpop.f32.mrb[5].mxu1 }
 0x1f5   : > { %v769_v32 = vadd.f32 %v768_v30, %v668_v14  ;;  %v1310_v33 = vpop.f32.mrb[6].mxu1  ;;  %1311 = vmatprep.subr.bf16.mxu0 %v795_v27 }
 0x1f6   : > { %v780_v34 = vadd.f32 %v1310_v33, %v683_v31  ;;  %v771_v35 = vpop.f32.mrb[7].mxu1  ;;  %1312 = vmatpush3.bf16.msra.mxu0 %v795_v27  ;;  %v789_v37 = vmax.f32 %v777_v29, 0.0  ;;  %v988_v33 = vpop.permute.xlu0 %987 }
 0x1f7   : > { %v772_v36 = vadd.f32 %v771_v35, %v673_v19  ;;  %1313 = vmatprep.subr.bf16.mxu0 %v796_v25  ;;  %v787_v39 = vmax.f32 %v769_v32, 0.0  ;;  %v1488_v19 = vmov -inf  }
 0x1f8   : > { %v790_v38 = vmax.f32 %v780_v34, 0.0  ;;  %1024 = vst.msk [vmem:[#allocation2] sm:$0xff] %vm1023_vm4, %v1488_v19  ;;  %1025 = vst.msk [vmem:[#allocation2 + $0x8] sm:$0xff] %vm1023_vm4, %v1488_v19 }
 0x1f9   : > { %v788_v40 = vmax.f32 %v772_v36, 0.0  ;;  %v993_v36 = vpop.permute.xlu1 %992 }
 0x1fa   : > { %v798_v41 = vpack.c.bf16 %v790_v38, %v789_v37  ;;  %1314 = vmatpush3.bf16.msra.mxu0 %v796_v25 }
 0x1fb   : > { %v797_v42 = vpack.c.bf16 %v788_v40, %v787_v39 }
 0x1fd   : > { %1315 = vmatprep.subr.bf16.mxu0 %v797_v42 }
 0x1fe   : > { %1316 = vmatpush3.bf16.msra.mxu0 %v797_v42 }
 0x1ff   : > { %1317 = vmatprep.subr.bf16.mxu0 %v798_v41 }
 0x202   : > { %1318 = vmatpush3.bf16.msra.mxu0 %v798_v41 }
 0x203   : > { %1323 = vmatprep.subr.bf16.mxu0 %v1486_v44 }
 0x205   : > { %1320 = vmatmul.mubr.msk.bf16.vlgmr.msra.gmra.mrb[8].mxu0 %vm705_vm1, %v1403_v43 }
 0x206   : > { %1327 = vmatprep.mubr.msk.bf16.mxu0 %vm1487_vm2, %v1486_v44 }
 0x2d8   : > { %v1321_v48 = vpop.f32.mrb[8].mxu0 }
 0x2d9   : > { %v882_v49 = vadd.f32 %v1321_v48, %v816_v47  ;;  %v873_v50 = vpop.f32.mrb[9].mxu0 }
 0x2da   : > { %v874_v52 = vadd.f32 %v873_v50, %v806_v45  ;;  %v1322_v53 = vpop.f32.mrb[10].mxu0 }
 0x2db   : > { %v1254_v54 = vmul.f32 -1.442695, %v882_v49  ;;  %v885_v55 = vadd.f32 %v1322_v53, %v821_v51  ;;  %v876_v56 = vpop.f32.mrb[11].mxu0 }
 0x2dc   : > { %v1252_v57 = vmul.f32 -1.442695, %v874_v52  ;;  %v877_v58 = vadd.f32 %v876_v56, %v811_v46  ;;  %v1027_v56 = vld [vmem:[#allocation2 + $0x8] sm:$0xff] }
 0x2dd   : > { %1405 = vpow2.f32 %v1254_v54  ;;  %v1255_v59 = vmul.f32 -1.442695, %v885_v55  ;;  %v1026_v54 = vld [vmem:[#allocation2] sm:$0xff] }
 0x2de   : > { %1407 = vpow2.f32 %v1252_v57  ;;  %v1253_v60 = vmul.f32 -1.442695, %v877_v58 }
 0x2df   : > { %1409 = vpow2.f32 %v1255_v59 }
 0x2e0   : > { %1411 = vpow2.f32 %v1253_v60 }
 0x2e7   : > { %v1406_v61 = vpop.eup %1405 }
 0x2e8   : > { %v1408_v62 = vpop.eup %1407  ;;  %v902_v63 = vadd.f32 1.0, %v1406_v61 }
 0x2e9   : > { %v1410_v0 = vpop.eup %1409  ;;  %v900_v1 = vadd.f32 1.0, %v1408_v62 }
 0x2ea   : > { %v1412_v2 = vpop.eup %1411  ;;  %1413 = vrcp.f32 %v902_v63  ;;  %v903_v3 = vadd.f32 1.0, %v1410_v0 }
 0x2eb   : > { %1415 = vrcp.f32 %v900_v1  ;;  %v901_v4 = vadd.f32 1.0, %v1412_v2 }
 0x2ec   : > { %1417 = vrcp.f32 %v903_v3 }
 0x2ed   : > { %1419 = vrcp.f32 %v901_v4 }
 0x2f4   : > { %v1414_v5 = vpop.eup %1413 }
 0x2f5   : > { %v1416_v6 = vpop.eup %1415  ;;  %v968_v13 = vmul.f32 %v1414_v5, %v1414_v5 }
 0x2f6   : > { %v1418_v7 = vpop.eup %1417  ;;  %v966_v10 = vmul.f32 %v1416_v6, %v1416_v6 }
 0x2f7   : > { %v1420_v8 = vpop.eup %1419  ;;  %v915_v9 = vpack.c.bf16 %v1418_v7, %v1414_v5  ;;  %v969_v15 = vmul.f32 %v1418_v7, %v1418_v7 }
 0x2f8   : > { %v967_v11 = vmul.f32 %v1420_v8, %v1420_v8  ;;  %v914_v12 = vpack.c.bf16 %v1420_v8, %v1416_v6 }
 0x2fa   : > { %1324 = vmatpush3.bf16.msra.mxu0 %v914_v12  ;;  %v970_v14 = vadd.f32 %v967_v11, %v966_v10 }
 0x2fb   : > { %1325 = vmatprep.subr.bf16.mxu0 %v1486_v44 }
 0x2fc   : > { %v971_v16 = vadd.f32 %v970_v14, %v968_v13 }
 0x2fe   : > { %1326 = vmatpush3.bf16.msra.mxu0 %v915_v9  ;;  %v972_v18 = vadd.f32 %v971_v16, %v969_v15 }
 0x300   : > { %v973_v20 = vrot.slane %v972_v18, 4 }
 0x301   : > { %1328 = vmatmul.mubr.msk.bf16.vlgmr.msra.gmra.mrb[12].mxu0 %vm921_vm3, %v1404_v17 }
 0x302   : > { %v974_v21 = vadd.f32 %v973_v20, %v972_v18 }
 0x304   : > { %v975_v22 = vrot.slane %v974_v21, 2 }
 0x306   : > { %v976_v23 = vadd.f32 %v975_v22, %v974_v21 }
 0x308   : > { %v977_v24 = vrot.slane %v976_v23, 1 }
 0x30a   : > { %v978_v26 = vadd.f32 %v977_v24, %v976_v23 }
 0x3d4   : > { %v959_v25 = vpop.f32.mrb[12].mxu0 }
 0x3d5   : > { %v979_v27 = vmul.f32 2.0, %v959_v25  ;;  %v1329_v28 = vpop.f32.mrb[13].mxu0 }
 0x3d6   : > { %v962_v29 = vpop.f32.mrb[14].mxu0 }
 0x3d7   : > { %v981_v30 = vsub.f32 %v978_v26, %v979_v27  ;;  %v980_v31 = vmul.f32 2.0, %v962_v29  ;;  %v1330_v32 = vpop.f32.mrb[15].mxu0 }
 0x3d9   : > { %v995_v34 = vadd.f32 %v988_v33, %v981_v30  ;;  %v982_v35 = vsub.f32 %v978_v26, %v980_v31 }
 0x3db   : > { %v997_v37 = vmax.f32 %v995_v34, 0.0  ;;  %v996_v38 = vadd.f32 %v993_v36, %v982_v35 }
 0x3dd   : > { %v998_v39 = vmax.f32 %v996_v38, 0.0  ;;  %v999_v40 = vadd.f32 1.0, %v997_v37  ;;  %v1005_v41 = vadd.f32 0.0001, %v997_v37 }
 0x3df   : > { %1421 = vlog2.f32 %v999_v40  ;;  %v1000_v42 = vadd.f32 1.0, %v998_v39  ;;  %v1006_v43 = vadd.f32 0.0001, %v998_v39 }
 0x3e0   : > { %1423 = vlog2.f32 %v1005_v41 }
 0x3e1   : > { %1425 = vlog2.f32 %v1000_v42 }
 0x3e2   : > { %1427 = vlog2.f32 %v1006_v43 }
 0x3e9   : > { %v1422_v44 = vpop.eup %1421 }
 0x3ea   : > { %v1424_v45 = vpop.eup %1423  ;;  %v1002_v46 = vmul.f32 0.6931472, %v1422_v44 }
 0x3eb   : > { %v1426_v47 = vpop.eup %1425  ;;  %v1008_v48 = vmul.f32 0.6931472, %v1424_v45 }
 0x3ec   : > { %v1428_v49 = vpop.eup %1427  ;;  %v1004_v50 = vmul.f32 0.6931472, %v1426_v47 }
 0x3ed   : > { %v1011_v51 = vsub.f32 %v1002_v46, %v1008_v48  ;;  %v1010_v52 = vmul.f32 0.6931472, %v1428_v49 }
 0x3ef   : > { %1015 = vmax.xlane.f32.xlu0 %v1011_v51  ;;  %1013 = vst [vmem:[%s1727_s25] sm:$0xff] %v1011_v51  ;;  %v1012_v53 = vsub.f32 %v1004_v50, %v1010_v52 }
 0x3f1   : > { %1017 = vmax.xlane.f32.xlu1 %v1012_v53  ;;  %1014 = vst [vmem:[%s1727_s25 + $0x8] sm:$0xff] %v1012_v53 }
 0x3f6   : > { %v1090_v62 = vld [vmem:[%s1727_s25] sm:$0xff] (%p1592_p6) }
 0x3f7   : > { %1091 = vst [vmem:[%s1060_s9] sm:$0xff] (%p1592_p6), %v1090_v62 }
 0x3f8   : > { %v1092_v63 = vld [vmem:[%s1727_s25 + $0x8] sm:$0xff] (%p1592_p6) }
 0x3f9   : > { %1093 = vst [vmem:[%s1060_s9 + $0x10] sm:$0xff] (%p1592_p6), %v1092_v63 }
 0x47c   : > { %v1016_v55 = vpop.xlane.xlu0 %1015 }
 0x47d   : > { %v1028_v57 = vmax.f32 %v1026_v54, %v1016_v55 }
 0x47e   : > { %v1018_v58 = vpop.xlane.xlu1 %1017 }
 0x47f   : > { %1031 = vst.msk [vmem:[#allocation2] sm:$0xff] %vm1023_vm4, %v1028_v57  ;;  %v1029_v59 = vmax.f32 %v1027_v56, %v1018_v58 }
 0x481   : > { %1032 = vst.msk [vmem:[#allocation2 + $0x8] sm:$0xff] %vm1023_vm4, %v1029_v59 }
 0x483   : > { %1055 = sbr.rel (!%p1592_p6) target bundleno = 1162 (0x48a), region = 109 }
 0x486   : > { %v1036_v60 = vld [vmem:[#allocation2] sm:$0xff] }
 0x487   : > { %1038 = vst.msk [vmem:[%s453_s12] sm:$0xff] %vm1023_vm4, %v1036_v60 }
 0x488   : > { %v1037_v61 = vld [vmem:[#allocation2 + $0x8] sm:$0xff] }
 0x489   : > { %1039 = vst.msk [vmem:[%s453_s12 + $0x8] sm:$0xff] %vm1023_vm4, %v1037_v61 }
 0x48a PF: > { %s21_s19 = sadd.s32 1, %s1483_s19   ;;  %s1788_s24 = sld [smem:[#allocation5_spill]] }
 0x48b   : > { %p18_p0 = scmp.ge.s32.totalorder %s21_s19, 6   ;;  %s1789_s13 = smov %s1463_s14 }
 0x48c   : > { %s1790_s14 = smov %s1600_s28  ;;  %s1791_s15 = smov %s1475_s17 }
 0x48d   : > { %s1792_s16 = smov %s1479_s18  ;;  %s1794_s18 = smov %s1800_s21 }
 0x48e   :  { %20 = sbr.rel (!%p18_p0) target bundleno = 6 (0x6), region = 190 }
 0x490   : > { %s1793_s17 = smov %s1788_s24 }

</bundles_post_ra>
